<compile_context>
chip_gen: v7x
topology: tpu7x:2x2x1
jax: 0.10.0
libtpu: 0.0.40
codegen_flags: <defaults>
</compile_context>

<pallas_src>
import functools

import jax
import jax.numpy as jnp
import numpy as np
from jax import lax
from jax.experimental import pallas as pl
from jax.experimental.pallas import tpu as pltpu


def _gcl_kernel(rgb_ref, depth_ref, ir_ref, fus_ref, fus_sel_ref, t_ref,
                tgt_col_ref, tgt_row_ref, tgt_sel_ref, loss_ref, *, T):
    """All hot-path math (grams on MXU, row-normalize, masked contrastive NLL) in VMEM."""
    inv_T = 1.0 / T

    rgb = rgb_ref[...]
    depth = depth_ref[...]
    ir = ir_ref[...]
    fus = fus_ref[...]
    fus_sel = fus_sel_ref[...]
    t = t_ref[...]

    B = t.shape[0]
    M = fus_sel.shape[0]

    eye = (lax.broadcasted_iota(jnp.int32, (B, B), 0)
           == lax.broadcasted_iota(jnp.int32, (B, B), 1)).astype(jnp.float32)

    def l2norm_rows(g):
        # F.normalize(p=2, dim=-1, eps=1e-12) == g * rsqrt(max(sum(g^2), eps^2)).
        # rsqrt runs on the EUP and turns the (rows, cols) divide into a multiply.
        s = jnp.sum(g * g, axis=-1, keepdims=True)
        return g * lax.rsqrt(jnp.maximum(s, 1e-24))

    def self_graph(x):
        # ||x_i - x_j||^2 = d_i + d_j - 2<x_i, x_j>; both orientations of the squared-norm
        # vector come from the gram diagonal (no extra matmul, no transpose). Diagonal is 0.
        gram = jnp.einsum("pd,qd->pq", x, x, preferred_element_type=jnp.float32)
        gd = gram * eye
        d_col = jnp.sum(gd, axis=-1, keepdims=True)   # (B, 1)  ||x_i||^2
        d_row = jnp.sum(gd, axis=0, keepdims=True)    # (1, B)  ||x_j||^2
        return l2norm_rows(d_col + d_row - 2.0 * gram)

    # ---- stage 1: row-normalized pairwise squared-distance graphs ----
    n_t = self_graph(t)           # (B, B)
    n_rgb = self_graph(rgb)
    n_ir = self_graph(ir)
    n_depth = self_graph(depth)

    # Fusion graph is a cross distance (gathered rows vs all rows); the diag trick does not
    # apply there, so the "other"-side norms use one tiny (1,D)x(D,B) MXU op.
    ones_row = jnp.ones((1, fus.shape[-1]), jnp.float32)
    d_fus_row = jnp.einsum("od,bd->ob", ones_row, fus * fus,
                           preferred_element_type=jnp.float32)         # (1, B)
    d_sel_col = jnp.sum(fus_sel * fus_sel, axis=-1, keepdims=True)     # (M, 1)
    gram_fs = jnp.einsum("md,bd->mb", fus_sel, fus,
                         preferred_element_type=jnp.float32)           # (M, B)
    n_fus = l2norm_rows(d_sel_col + d_fus_row - 2.0 * gram_fs)         # (M, B)

    # ---- stage 2: rows are unit-L2, so 1 - 0.5*||a-b||^2 == <a, b> (cosine) ----
    # Fuse rgb/ir/depth into a single wide matmul; fusion is a second small one.
    n3 = jnp.concatenate([n_rgb, n_ir, n_depth], axis=0)               # (3B, B)
    f3 = jnp.einsum("ab,cb->ac", n_t, n3,
                    preferred_element_type=jnp.float32) * inv_T        # (B, 3B)
    ff = jnp.einsum("ab,mb->am", n_t, n_fus,
                    preferred_element_type=jnp.float32) * inv_T        # (B, M)
    e3 = jnp.exp(f3)
    ef = jnp.exp(ff)

    # Masks built in-kernel from int32 targets: 1.0 where labels differ (negatives).
    mask = (tgt_col_ref[...] != tgt_row_ref[...]).astype(jnp.float32)     # (B, B)
    mask_f = (tgt_col_ref[...] != tgt_sel_ref[...]).astype(jnp.float32)   # (B, M)
    pos = 1.0 - mask
    pos_f = 1.0 - mask_f

    # NLL positive-count denominators: exact (B,1) divides, broadcast as multiplies.
    inv_den = 1.0 / jnp.sum(pos, axis=-1, keepdims=True)                   # (B, 1)
    inv_den_f = 1.0 / (jnp.sum(pos_f, axis=-1, keepdims=True) + 1e-12)     # (B, 1)

    def masked_neg_log_p(f, e, neg_mask, pos_mask):
        # p = e_pos / (sum(e*neg) + e_pos);  -log(p + 1e-12) * pos == (log(denom) - f) * pos
        # up to the 1e-12 eps (|delta| <= 1e-12/p, far below tolerance) -- no wide divide.
        neg_sum = jnp.sum(e * neg_mask, axis=-1, keepdims=True)
        denom = neg_sum + e * pos_mask
        return (jnp.log(denom) - f) * pos_mask

    l3 = (masked_neg_log_p(f3[:, 0:B],       e3[:, 0:B],       mask, pos)
          + masked_neg_log_p(f3[:, B:2 * B], e3[:, B:2 * B],   mask, pos)
          + masked_neg_log_p(f3[:, 2 * B:],  e3[:, 2 * B:],    mask, pos)) * inv_den
    lf = masked_neg_log_p(ff, ef, mask_f, pos_f) * inv_den_f

    def total_sum(x):  # full reduction kept as (1,1): lane reduce, then sublane reduce
        return jnp.sum(jnp.sum(x, axis=-1, keepdims=True), axis=0, keepdims=True)

    loss_ref[...] = (total_sum(l3) + 7.0 * total_sum(lf)) * (1.0 / B)


def gcl_loss(fm_rgb, fm_depth, fm_ir, fm_fusion, multi_index, fm_t, targets, T=0.1):
    """Pallas GCL forward.  Glue kept in XLA: the dynamic row gather by `multi_index`
    and a zero-pad of the feature dim to a multiple of 128 (distance/gram neutral)."""
    B, D = fm_t.shape
    M = int(multi_index.shape[0])

    # TODO(synk): fm_fusion[multi_index] / targets[multi_index] stay as an XLA gather;
    # an in-kernel DMA gather (pl.ANY + make_async_copy) is not worth it at these sizes.
    fm_fusion_sel = fm_fusion[multi_index]
    targets = targets.astype(jnp.int32)
    targets_sel = targets[multi_index]

    d_pad = ((D + 127) // 128) * 128
    if d_pad != D:
        padw = ((0, 0), (0, d_pad - D))
        fm_rgb, fm_depth, fm_ir, fm_fusion, fm_fusion_sel, fm_t = (
            jnp.pad(a, padw) for a in
            (fm_rgb, fm_depth, fm_ir, fm_fusion, fm_fusion_sel, fm_t))

    tgt_col = targets.reshape(B, 1)
    tgt_row = targets.reshape(1, B)
    tgt_sel_row = targets_sel.reshape(1, M)

    flops = int(2 * (4 * B * B + M * B + B) * d_pad        # stage-1 grams (+ ones-row)
                + 2 * B * B * 3 * B + 2 * B * B * M        # stage-2 cosine matmuls
                + 40 * B * (3 * B + M))                    # elementwise epilogue
    transcendentals = int(2 * B * (3 * B + M) + 4 * B + M)  # exp + log + rsqrt
    bytes_accessed = int(4 * ((5 * B + M) * d_pad + 2 * B + M + 1))

    vmem = pl.BlockSpec(memory_space=pltpu.MemorySpace.VMEM)
    # NOTE: single fused, gridless kernel -- the whole problem (a batch-level loss) fits
    # VMEM comfortably at realistic B.  For very large B (graphs no longer resident,
    # especially under v7x's 64 MiB cap) split into a stage-1 graph kernel plus an
    # anchor-row-gridded stage-2 kernel with "parallel" dimension semantics.
    loss = pl.pallas_call(
        functools.partial(_gcl_kernel, T=float(T)),
        out_shape=jax.ShapeDtypeStruct((1, 1), jnp.float32),
        in_specs=[vmem] * 9,
        out_specs=vmem,
        compiler_params=pltpu.CompilerParams(vmem_limit_bytes=48 * 1024 * 1024),
        cost_estimate=pl.CostEstimate(flops=flops, transcendentals=transcendentals,
                                      bytes_accessed=bytes_accessed),
    )(fm_rgb, fm_depth, fm_ir, fm_fusion, fm_fusion_sel, fm_t,
      tgt_col, tgt_row, tgt_sel_row)
    return loss[0, 0]


def gcl_reference(fm_rgb, fm_depth, fm_ir, fm_fusion, multi_index, fm_t, targets, T=0.1):
    """Pure-JAX reference mirroring the PyTorch forward (broadcast form)."""
    def pdist2(x, y):
        return jnp.sum((x[:, None, :] - y[None, :, :]) ** 2, axis=-1)

    def normalize(g):
        n = jnp.sqrt(jnp.sum(g * g, axis=-1, keepdims=True))
        return g / jnp.maximum(n, 1e-12)

    def softmax(f, mask_neg):
        exp_f = jnp.exp(f / T)
        exp_neg = exp_f * mask_neg
        exp_pos = exp_f * (1 - mask_neg)
        return exp_pos / (jnp.sum(exp_neg, -1, keepdims=True) + exp_pos)

    n_t = normalize(pdist2(fm_t, fm_t))
    n_rgb = normalize(pdist2(fm_rgb, fm_rgb))
    n_ir = normalize(pdist2(fm_ir, fm_ir))
    n_depth = normalize(pdist2(fm_depth, fm_depth))
    n_fus = normalize(pdist2(fm_fusion[multi_index], fm_fusion))

    p_rgb = 1 - 0.5 * pdist2(n_t, n_rgb)
    p_ir = 1 - 0.5 * pdist2(n_t, n_ir)
    p_depth = 1 - 0.5 * pdist2(n_t, n_depth)
    p_fusion = 1 - 0.5 * pdist2(n_t, n_fus)

    mask = (targets[:, None] != targets[None, :]).astype(jnp.float32)
    mask_f = (targets[:, None] != targets[multi_index][None, :]).astype(jnp.float32)

    p_rgb = softmax(p_rgb, mask)
    p_depth = softmax(p_depth, mask)
    p_ir = softmax(p_ir, mask)
    p_fusion = softmax(p_fusion, mask_f)

    B = fm_t.shape[0]
    pos = 1 - mask
    pos_f = 1 - mask_f
    loss_rgb = -jnp.log(p_rgb + 1e-12) * pos / jnp.sum(pos, -1, keepdims=True)
    loss_depth = -jnp.log(p_depth + 1e-12) * pos / jnp.sum(pos, -1, keepdims=True)
    loss_ir = -jnp.log(p_ir + 1e-12) * pos / jnp.sum(pos, -1, keepdims=True)
    loss_fusion = -jnp.log(p_fusion + 1e-12) * pos_f / (jnp.sum(pos_f, -1, keepdims=True) + 1e-12)
    return (jnp.mean(jnp.sum(loss_rgb, -1)) + jnp.mean(jnp.sum(loss_depth, -1))
            + jnp.mean(jnp.sum(loss_ir, -1)) + 7 * jnp.sum(loss_fusion) / B)


if __name__ == "__main__":
    key = jax.random.PRNGKey(0)
    B, D, M = 8, 32, 4
    k = jax.random.split(key, 6)
    fm_rgb = jax.random.normal(k[0], (B, D), dtype=jnp.float32)
    fm_depth = jax.random.normal(k[1], (B, D), dtype=jnp.float32)
    fm_ir = jax.random.normal(k[2], (B, D), dtype=jnp.float32)
    fm_fusion = jax.random.normal(k[3], (B, D), dtype=jnp.float32)
    fm_t = jax.random.normal(k[4], (B, D), dtype=jnp.float32)
    targets = jax.random.randint(k[5], (B,), 0, 2, dtype=jnp.int32)
    multi_index = jnp.array([0, 2, 4, 6], dtype=jnp.int32)

    loss = gcl_loss(fm_rgb, fm_depth, fm_ir, fm_fusion, multi_index, fm_t, targets)
    loss = jax.block_until_ready(loss)

    ref = jax.block_until_ready(
        gcl_reference(fm_rgb, fm_depth, fm_ir, fm_fusion, multi_index, fm_t, targets))
    assert np.allclose(np.asarray(loss), np.asarray(ref), rtol=1e-3, atol=1e-3), (loss, ref)
    print("KERNEL_OK")
</pallas_src>

<mosaic_0001>
module attributes {stable_mosaic.version = 11 : i64} {
  func.func @_gcl_kernel(%arg0: memref<8x128xf32, #tpu.memory_space<vmem>>, %arg1: memref<8x128xf32, #tpu.memory_space<vmem>>, %arg2: memref<8x128xf32, #tpu.memory_space<vmem>>, %arg3: memref<8x128xf32, #tpu.memory_space<vmem>>, %arg4: memref<4x128xf32, #tpu.memory_space<vmem>>, %arg5: memref<8x128xf32, #tpu.memory_space<vmem>>, %arg6: memref<8x1xi32, #tpu.memory_space<vmem>>, %arg7: memref<1x8xi32, #tpu.memory_space<vmem>>, %arg8: memref<1x4xi32, #tpu.memory_space<vmem>>, %arg9: memref<1x1xf32, #tpu.memory_space<vmem>>) attributes {dimension_semantics = [], scalar_prefetch = 0 : i64, scratch_operands = 0 : i64, tpu.core_type = #tpu.core_type<tc>} {
    %c0 = arith.constant 0 : index
    %c0_0 = arith.constant 0 : index
    %0 = vector.load %arg0[%c0, %c0_0] : memref<8x128xf32, #tpu.memory_space<vmem>>, vector<8x128xf32>
    %c0_1 = arith.constant 0 : index
    %c0_2 = arith.constant 0 : index
    %1 = vector.load %arg1[%c0_1, %c0_2] : memref<8x128xf32, #tpu.memory_space<vmem>>, vector<8x128xf32>
    %c0_3 = arith.constant 0 : index
    %c0_4 = arith.constant 0 : index
    %2 = vector.load %arg2[%c0_3, %c0_4] : memref<8x128xf32, #tpu.memory_space<vmem>>, vector<8x128xf32>
    %c0_5 = arith.constant 0 : index
    %c0_6 = arith.constant 0 : index
    %3 = vector.load %arg3[%c0_5, %c0_6] : memref<8x128xf32, #tpu.memory_space<vmem>>, vector<8x128xf32>
    %c0_7 = arith.constant 0 : index
    %c0_8 = arith.constant 0 : index
    %4 = vector.load %arg4[%c0_7, %c0_8] : memref<4x128xf32, #tpu.memory_space<vmem>>, vector<4x128xf32>
    %c0_9 = arith.constant 0 : index
    %c0_10 = arith.constant 0 : index
    %5 = vector.load %arg5[%c0_9, %c0_10] : memref<8x128xf32, #tpu.memory_space<vmem>>, vector<8x128xf32>
    %6 = tpu.iota {dimensions = array<i32: 0>} : vector<8x8xi32>
    %7 = tpu.iota {dimensions = array<i32: 1>} : vector<8x8xi32>
    %8 = arith.cmpi eq, %6, %7 : vector<8x8xi32>
    %9 = arith.extui %8 : vector<8x8xi1> to vector<8x8xi32>
    %10 = arith.sitofp %9 : vector<8x8xi32> to vector<8x8xf32>
    "tpu.trace_start"() <{level = 10 : i32, message = "pd,qd->pq"}> : () -> ()
    %cst = arith.constant dense<0.000000e+00> : vector<8x8xf32>
    %11 = tpu.matmul %5, %5, %cst {dimension_numbers = #tpu.dot_dimension_numbers<[1], [1], [0], [0], [0, 0, 1, 0], [], []>} : vector<8x128xf32>, vector<8x128xf32>, vector<8x8xf32> -> vector<8x8xf32>
    "tpu.trace_stop"() : () -> ()
    %12 = arith.mulf %11, %10 : vector<8x8xf32>
    %cst_11 = arith.constant dense<0.000000e+00> : vector<8xf32>
    %13 = vector.multi_reduction <add>, %12, %cst_11 [1] : vector<8x8xf32> to vector<8xf32>
    %14 = vector.shape_cast %13 : vector<8xf32> to vector<8x1xf32>
    %cst_12 = arith.constant dense<0.000000e+00> : vector<8xf32>
    %15 = vector.multi_reduction <add>, %12, %cst_12 [0] : vector<8x8xf32> to vector<8xf32>
    %16 = vector.shape_cast %15 : vector<8xf32> to vector<1x8xf32>
    %17 = vector.broadcast %14 : vector<8x1xf32> to vector<8x8xf32>
    %18 = vector.broadcast %16 : vector<1x8xf32> to vector<8x8xf32>
    %19 = arith.addf %17, %18 : vector<8x8xf32>
    %cst_13 = arith.constant 2.000000e+00 : f32
    %20 = vector.broadcast %cst_13 : f32 to vector<8x8xf32>
    %21 = arith.mulf %20, %11 : vector<8x8xf32>
    %22 = arith.subf %19, %21 : vector<8x8xf32>
    %23 = arith.mulf %22, %22 : vector<8x8xf32>
    %cst_14 = arith.constant dense<0.000000e+00> : vector<8xf32>
    %24 = vector.multi_reduction <add>, %23, %cst_14 [1] : vector<8x8xf32> to vector<8xf32>
    %25 = vector.shape_cast %24 : vector<8xf32> to vector<8x1xf32>
    %cst_15 = arith.constant 1.000000e-24 : f32
    %26 = vector.broadcast %cst_15 : f32 to vector<8x1xf32>
    %27 = arith.maximumf %25, %26 : vector<8x1xf32>
    %28 = math.rsqrt %27 : vector<8x1xf32>
    %29 = vector.broadcast %28 : vector<8x1xf32> to vector<8x8xf32>
    %30 = arith.mulf %22, %29 : vector<8x8xf32>
    "tpu.trace_start"() <{level = 10 : i32, message = "pd,qd->pq"}> : () -> ()
    %cst_16 = arith.constant dense<0.000000e+00> : vector<8x8xf32>
    %31 = tpu.matmul %0, %0, %cst_16 {dimension_numbers = #tpu.dot_dimension_numbers<[1], [1], [0], [0], [0, 0, 1, 0], [], []>} : vector<8x128xf32>, vector<8x128xf32>, vector<8x8xf32> -> vector<8x8xf32>
    "tpu.trace_stop"() : () -> ()
    %32 = arith.mulf %31, %10 : vector<8x8xf32>
    %cst_17 = arith.constant dense<0.000000e+00> : vector<8xf32>
    %33 = vector.multi_reduction <add>, %32, %cst_17 [1] : vector<8x8xf32> to vector<8xf32>
    %34 = vector.shape_cast %33 : vector<8xf32> to vector<8x1xf32>
    %cst_18 = arith.constant dense<0.000000e+00> : vector<8xf32>
    %35 = vector.multi_reduction <add>, %32, %cst_18 [0] : vector<8x8xf32> to vector<8xf32>
    %36 = vector.shape_cast %35 : vector<8xf32> to vector<1x8xf32>
    %37 = vector.broadcast %34 : vector<8x1xf32> to vector<8x8xf32>
    %38 = vector.broadcast %36 : vector<1x8xf32> to vector<8x8xf32>
    %39 = arith.addf %37, %38 : vector<8x8xf32>
    %cst_19 = arith.constant 2.000000e+00 : f32
    %40 = vector.broadcast %cst_19 : f32 to vector<8x8xf32>
    %41 = arith.mulf %40, %31 : vector<8x8xf32>
    %42 = arith.subf %39, %41 : vector<8x8xf32>
    %43 = arith.mulf %42, %42 : vector<8x8xf32>
    %cst_20 = arith.constant dense<0.000000e+00> : vector<8xf32>
    %44 = vector.multi_reduction <add>, %43, %cst_20 [1] : vector<8x8xf32> to vector<8xf32>
    %45 = vector.shape_cast %44 : vector<8xf32> to vector<8x1xf32>
    %cst_21 = arith.constant 1.000000e-24 : f32
    %46 = vector.broadcast %cst_21 : f32 to vector<8x1xf32>
    %47 = arith.maximumf %45, %46 : vector<8x1xf32>
    %48 = math.rsqrt %47 : vector<8x1xf32>
    %49 = vector.broadcast %48 : vector<8x1xf32> to vector<8x8xf32>
    %50 = arith.mulf %42, %49 : vector<8x8xf32>
    "tpu.trace_start"() <{level = 10 : i32, message = "pd,qd->pq"}> : () -> ()
    %cst_22 = arith.constant dense<0.000000e+00> : vector<8x8xf32>
    %51 = tpu.matmul %2, %2, %cst_22 {dimension_numbers = #tpu.dot_dimension_numbers<[1], [1], [0], [0], [0, 0, 1, 0], [], []>} : vector<8x128xf32>, vector<8x128xf32>, vector<8x8xf32> -> vector<8x8xf32>
    "tpu.trace_stop"() : () -> ()
    %52 = arith.mulf %51, %10 : vector<8x8xf32>
    %cst_23 = arith.constant dense<0.000000e+00> : vector<8xf32>
    %53 = vector.multi_reduction <add>, %52, %cst_23 [1] : vector<8x8xf32> to vector<8xf32>
    %54 = vector.shape_cast %53 : vector<8xf32> to vector<8x1xf32>
    %cst_24 = arith.constant dense<0.000000e+00> : vector<8xf32>
    %55 = vector.multi_reduction <add>, %52, %cst_24 [0] : vector<8x8xf32> to vector<8xf32>
    %56 = vector.shape_cast %55 : vector<8xf32> to vector<1x8xf32>
    %57 = vector.broadcast %54 : vector<8x1xf32> to vector<8x8xf32>
    %58 = vector.broadcast %56 : vector<1x8xf32> to vector<8x8xf32>
    %59 = arith.addf %57, %58 : vector<8x8xf32>
    %cst_25 = arith.constant 2.000000e+00 : f32
    %60 = vector.broadcast %cst_25 : f32 to vector<8x8xf32>
    %61 = arith.mulf %60, %51 : vector<8x8xf32>
    %62 = arith.subf %59, %61 : vector<8x8xf32>
    %63 = arith.mulf %62, %62 : vector<8x8xf32>
    %cst_26 = arith.constant dense<0.000000e+00> : vector<8xf32>
    %64 = vector.multi_reduction <add>, %63, %cst_26 [1] : vector<8x8xf32> to vector<8xf32>
    %65 = vector.shape_cast %64 : vector<8xf32> to vector<8x1xf32>
    %cst_27 = arith.constant 1.000000e-24 : f32
    %66 = vector.broadcast %cst_27 : f32 to vector<8x1xf32>
    %67 = arith.maximumf %65, %66 : vector<8x1xf32>
    %68 = math.rsqrt %67 : vector<8x1xf32>
    %69 = vector.broadcast %68 : vector<8x1xf32> to vector<8x8xf32>
    %70 = arith.mulf %62, %69 : vector<8x8xf32>
    "tpu.trace_start"() <{level = 10 : i32, message = "pd,qd->pq"}> : () -> ()
    %cst_28 = arith.constant dense<0.000000e+00> : vector<8x8xf32>
    %71 = tpu.matmul %1, %1, %cst_28 {dimension_numbers = #tpu.dot_dimension_numbers<[1], [1], [0], [0], [0, 0, 1, 0], [], []>} : vector<8x128xf32>, vector<8x128xf32>, vector<8x8xf32> -> vector<8x8xf32>
    "tpu.trace_stop"() : () -> ()
    %72 = arith.mulf %71, %10 : vector<8x8xf32>
    %cst_29 = arith.constant dense<0.000000e+00> : vector<8xf32>
    %73 = vector.multi_reduction <add>, %72, %cst_29 [1] : vector<8x8xf32> to vector<8xf32>
    %74 = vector.shape_cast %73 : vector<8xf32> to vector<8x1xf32>
    %cst_30 = arith.constant dense<0.000000e+00> : vector<8xf32>
    %75 = vector.multi_reduction <add>, %72, %cst_30 [0] : vector<8x8xf32> to vector<8xf32>
    %76 = vector.shape_cast %75 : vector<8xf32> to vector<1x8xf32>
    %77 = vector.broadcast %74 : vector<8x1xf32> to vector<8x8xf32>
    %78 = vector.broadcast %76 : vector<1x8xf32> to vector<8x8xf32>
    %79 = arith.addf %77, %78 : vector<8x8xf32>
    %cst_31 = arith.constant 2.000000e+00 : f32
    %80 = vector.broadcast %cst_31 : f32 to vector<8x8xf32>
    %81 = arith.mulf %80, %71 : vector<8x8xf32>
    %82 = arith.subf %79, %81 : vector<8x8xf32>
    %83 = arith.mulf %82, %82 : vector<8x8xf32>
    %cst_32 = arith.constant dense<0.000000e+00> : vector<8xf32>
    %84 = vector.multi_reduction <add>, %83, %cst_32 [1] : vector<8x8xf32> to vector<8xf32>
    %85 = vector.shape_cast %84 : vector<8xf32> to vector<8x1xf32>
    %cst_33 = arith.constant 1.000000e-24 : f32
    %86 = vector.broadcast %cst_33 : f32 to vector<8x1xf32>
    %87 = arith.maximumf %85, %86 : vector<8x1xf32>
    %88 = math.rsqrt %87 : vector<8x1xf32>
    %89 = vector.broadcast %88 : vector<8x1xf32> to vector<8x8xf32>
    %90 = arith.mulf %82, %89 : vector<8x8xf32>
    %cst_34 = arith.constant 1.000000e+00 : f32
    %91 = vector.broadcast %cst_34 : f32 to vector<1x128xf32>
    %92 = arith.mulf %3, %3 : vector<8x128xf32>
    "tpu.trace_start"() <{level = 10 : i32, message = "od,bd->ob"}> : () -> ()
    %cst_35 = arith.constant dense<0.000000e+00> : vector<1x8xf32>
    %93 = tpu.matmul %91, %92, %cst_35 {dimension_numbers = #tpu.dot_dimension_numbers<[1], [1], [0], [0], [0, 0, 1, 0], [], []>} : vector<1x128xf32>, vector<8x128xf32>, vector<1x8xf32> -> vector<1x8xf32>
    "tpu.trace_stop"() : () -> ()
    %94 = arith.mulf %4, %4 : vector<4x128xf32>
    %cst_36 = arith.constant dense<0.000000e+00> : vector<4xf32>
    %95 = vector.multi_reduction <add>, %94, %cst_36 [1] : vector<4x128xf32> to vector<4xf32>
    %96 = vector.shape_cast %95 : vector<4xf32> to vector<4x1xf32>
    "tpu.trace_start"() <{level = 10 : i32, message = "md,bd->mb"}> : () -> ()
    %cst_37 = arith.constant dense<0.000000e+00> : vector<4x8xf32>
    %97 = tpu.matmul %4, %3, %cst_37 {dimension_numbers = #tpu.dot_dimension_numbers<[1], [1], [0], [0], [0, 0, 1, 0], [], []>} : vector<4x128xf32>, vector<8x128xf32>, vector<4x8xf32> -> vector<4x8xf32>
    "tpu.trace_stop"() : () -> ()
    %98 = vector.broadcast %96 : vector<4x1xf32> to vector<4x8xf32>
    %99 = vector.broadcast %93 : vector<1x8xf32> to vector<4x8xf32>
    %100 = arith.addf %98, %99 : vector<4x8xf32>
    %cst_38 = arith.constant 2.000000e+00 : f32
    %101 = vector.broadcast %cst_38 : f32 to vector<4x8xf32>
    %102 = arith.mulf %101, %97 : vector<4x8xf32>
    %103 = arith.subf %100, %102 : vector<4x8xf32>
    %104 = arith.mulf %103, %103 : vector<4x8xf32>
    %cst_39 = arith.constant dense<0.000000e+00> : vector<4xf32>
    %105 = vector.multi_reduction <add>, %104, %cst_39 [1] : vector<4x8xf32> to vector<4xf32>
    %106 = vector.shape_cast %105 : vector<4xf32> to vector<4x1xf32>
    %cst_40 = arith.constant 1.000000e-24 : f32
    %107 = vector.broadcast %cst_40 : f32 to vector<4x1xf32>
    %108 = arith.maximumf %106, %107 : vector<4x1xf32>
    %109 = math.rsqrt %108 : vector<4x1xf32>
    %110 = vector.broadcast %109 : vector<4x1xf32> to vector<4x8xf32>
    %111 = arith.mulf %103, %110 : vector<4x8xf32>
    %112 = tpu.concatenate %50, %70, %90 in 0 : vector<8x8xf32>, vector<8x8xf32>, vector<8x8xf32> -> vector<24x8xf32>
    "tpu.trace_start"() <{level = 10 : i32, message = "ab,cb->ac"}> : () -> ()
    %cst_41 = arith.constant dense<0.000000e+00> : vector<8x24xf32>
    %113 = tpu.matmul %30, %112, %cst_41 {dimension_numbers = #tpu.dot_dimension_numbers<[1], [1], [0], [0], [0, 0, 1, 0], [], []>} : vector<8x8xf32>, vector<24x8xf32>, vector<8x24xf32> -> vector<8x24xf32>
    "tpu.trace_stop"() : () -> ()
    %cst_42 = arith.constant 1.000000e+01 : f32
    %114 = vector.broadcast %cst_42 : f32 to vector<8x24xf32>
    %115 = arith.mulf %113, %114 : vector<8x24xf32>
    "tpu.trace_start"() <{level = 10 : i32, message = "ab,mb->am"}> : () -> ()
    %cst_43 = arith.constant dense<0.000000e+00> : vector<8x4xf32>
    %116 = tpu.matmul %30, %111, %cst_43 {dimension_numbers = #tpu.dot_dimension_numbers<[1], [1], [0], [0], [0, 0, 1, 0], [], []>} : vector<8x8xf32>, vector<4x8xf32>, vector<8x4xf32> -> vector<8x4xf32>
    "tpu.trace_stop"() : () -> ()
    %cst_44 = arith.constant 1.000000e+01 : f32
    %117 = vector.broadcast %cst_44 : f32 to vector<8x4xf32>
    %118 = arith.mulf %116, %117 : vector<8x4xf32>
    %119 = math.exp %115 : vector<8x24xf32>
    %120 = math.exp %118 : vector<8x4xf32>
    %c0_45 = arith.constant 0 : index
    %c0_46 = arith.constant 0 : index
    %121 = vector.load %arg6[%c0_45, %c0_46] : memref<8x1xi32, #tpu.memory_space<vmem>>, vector<8x1xi32>
    %c0_47 = arith.constant 0 : index
    %c0_48 = arith.constant 0 : index
    %122 = vector.load %arg7[%c0_47, %c0_48] : memref<1x8xi32, #tpu.memory_space<vmem>>, vector<1x8xi32>
    %123 = vector.broadcast %121 : vector<8x1xi32> to vector<8x8xi32>
    %124 = vector.broadcast %122 : vector<1x8xi32> to vector<8x8xi32>
    %125 = arith.cmpi ne, %123, %124 : vector<8x8xi32>
    %126 = arith.extui %125 : vector<8x8xi1> to vector<8x8xi32>
    %127 = arith.sitofp %126 : vector<8x8xi32> to vector<8x8xf32>
    %c0_49 = arith.constant 0 : index
    %c0_50 = arith.constant 0 : index
    %128 = vector.load %arg6[%c0_49, %c0_50] : memref<8x1xi32, #tpu.memory_space<vmem>>, vector<8x1xi32>
    %c0_51 = arith.constant 0 : index
    %c0_52 = arith.constant 0 : index
    %129 = vector.load %arg8[%c0_51, %c0_52] : memref<1x4xi32, #tpu.memory_space<vmem>>, vector<1x4xi32>
    %130 = vector.broadcast %128 : vector<8x1xi32> to vector<8x4xi32>
    %131 = vector.broadcast %129 : vector<1x4xi32> to vector<8x4xi32>
    %132 = arith.cmpi ne, %130, %131 : vector<8x4xi32>
    %133 = arith.extui %132 : vector<8x4xi1> to vector<8x4xi32>
    %134 = arith.sitofp %133 : vector<8x4xi32> to vector<8x4xf32>
    %cst_53 = arith.constant 1.000000e+00 : f32
    %135 = vector.broadcast %cst_53 : f32 to vector<8x8xf32>
    %136 = arith.subf %135, %127 : vector<8x8xf32>
    %cst_54 = arith.constant 1.000000e+00 : f32
    %137 = vector.broadcast %cst_54 : f32 to vector<8x4xf32>
    %138 = arith.subf %137, %134 : vector<8x4xf32>
    %cst_55 = arith.constant dense<0.000000e+00> : vector<8xf32>
    %139 = vector.multi_reduction <add>, %136, %cst_55 [1] : vector<8x8xf32> to vector<8xf32>
    %140 = vector.shape_cast %139 : vector<8xf32> to vector<8x1xf32>
    %cst_56 = arith.constant 1.000000e+00 : f32
    %141 = vector.broadcast %cst_56 : f32 to vector<8x1xf32>
    %142 = arith.divf %141, %140 : vector<8x1xf32>
    %cst_57 = arith.constant dense<0.000000e+00> : vector<8xf32>
    %143 = vector.multi_reduction <add>, %138, %cst_57 [1] : vector<8x4xf32> to vector<8xf32>
    %144 = vector.shape_cast %143 : vector<8xf32> to vector<8x1xf32>
    %cst_58 = arith.constant 9.99999996E-13 : f32
    %145 = vector.broadcast %cst_58 : f32 to vector<8x1xf32>
    %146 = arith.addf %144, %145 : vector<8x1xf32>
    %cst_59 = arith.constant 1.000000e+00 : f32
    %147 = vector.broadcast %cst_59 : f32 to vector<8x1xf32>
    %148 = arith.divf %147, %146 : vector<8x1xf32>
    %149 = vector.extract_strided_slice %115 {offsets = [0, 0], sizes = [8, 8], strides = [1, 1]} : vector<8x24xf32> to vector<8x8xf32>
    %150 = vector.extract_strided_slice %119 {offsets = [0, 0], sizes = [8, 8], strides = [1, 1]} : vector<8x24xf32> to vector<8x8xf32>
    %151 = arith.mulf %150, %127 : vector<8x8xf32>
    %cst_60 = arith.constant dense<0.000000e+00> : vector<8xf32>
    %152 = vector.multi_reduction <add>, %151, %cst_60 [1] : vector<8x8xf32> to vector<8xf32>
    %153 = vector.shape_cast %152 : vector<8xf32> to vector<8x1xf32>
    %154 = arith.mulf %150, %136 : vector<8x8xf32>
    %155 = vector.broadcast %153 : vector<8x1xf32> to vector<8x8xf32>
    %156 = arith.addf %155, %154 : vector<8x8xf32>
    %157 = math.log %156 : vector<8x8xf32>
    %158 = arith.subf %157, %149 : vector<8x8xf32>
    %159 = arith.mulf %158, %136 : vector<8x8xf32>
    %160 = vector.extract_strided_slice %115 {offsets = [0, 8], sizes = [8, 8], strides = [1, 1]} : vector<8x24xf32> to vector<8x8xf32>
    %161 = vector.extract_strided_slice %119 {offsets = [0, 8], sizes = [8, 8], strides = [1, 1]} : vector<8x24xf32> to vector<8x8xf32>
    %162 = arith.mulf %161, %127 : vector<8x8xf32>
    %cst_61 = arith.constant dense<0.000000e+00> : vector<8xf32>
    %163 = vector.multi_reduction <add>, %162, %cst_61 [1] : vector<8x8xf32> to vector<8xf32>
    %164 = vector.shape_cast %163 : vector<8xf32> to vector<8x1xf32>
    %165 = arith.mulf %161, %136 : vector<8x8xf32>
    %166 = vector.broadcast %164 : vector<8x1xf32> to vector<8x8xf32>
    %167 = arith.addf %166, %165 : vector<8x8xf32>
    %168 = math.log %167 : vector<8x8xf32>
    %169 = arith.subf %168, %160 : vector<8x8xf32>
    %170 = arith.mulf %169, %136 : vector<8x8xf32>
    %171 = arith.addf %159, %170 : vector<8x8xf32>
    %172 = vector.extract_strided_slice %115 {offsets = [0, 16], sizes = [8, 8], strides = [1, 1]} : vector<8x24xf32> to vector<8x8xf32>
    %173 = vector.extract_strided_slice %119 {offsets = [0, 16], sizes = [8, 8], strides = [1, 1]} : vector<8x24xf32> to vector<8x8xf32>
    %174 = arith.mulf %173, %127 : vector<8x8xf32>
    %cst_62 = arith.constant dense<0.000000e+00> : vector<8xf32>
    %175 = vector.multi_reduction <add>, %174, %cst_62 [1] : vector<8x8xf32> to vector<8xf32>
    %176 = vector.shape_cast %175 : vector<8xf32> to vector<8x1xf32>
    %177 = arith.mulf %173, %136 : vector<8x8xf32>
    %178 = vector.broadcast %176 : vector<8x1xf32> to vector<8x8xf32>
    %179 = arith.addf %178, %177 : vector<8x8xf32>
    %180 = math.log %179 : vector<8x8xf32>
    %181 = arith.subf %180, %172 : vector<8x8xf32>
    %182 = arith.mulf %181, %136 : vector<8x8xf32>
    %183 = arith.addf %171, %182 : vector<8x8xf32>
    %184 = vector.broadcast %142 : vector<8x1xf32> to vector<8x8xf32>
    %185 = arith.mulf %183, %184 : vector<8x8xf32>
    %186 = arith.mulf %120, %134 : vector<8x4xf32>
    %cst_63 = arith.constant dense<0.000000e+00> : vector<8xf32>
    %187 = vector.multi_reduction <add>, %186, %cst_63 [1] : vector<8x4xf32> to vector<8xf32>
    %188 = vector.shape_cast %187 : vector<8xf32> to vector<8x1xf32>
    %189 = arith.mulf %120, %138 : vector<8x4xf32>
    %190 = vector.broadcast %188 : vector<8x1xf32> to vector<8x4xf32>
    %191 = arith.addf %190, %189 : vector<8x4xf32>
    %192 = math.log %191 : vector<8x4xf32>
    %193 = arith.subf %192, %118 : vector<8x4xf32>
    %194 = arith.mulf %193, %138 : vector<8x4xf32>
    %195 = vector.broadcast %148 : vector<8x1xf32> to vector<8x4xf32>
    %196 = arith.mulf %194, %195 : vector<8x4xf32>
    %cst_64 = arith.constant dense<0.000000e+00> : vector<8xf32>
    %197 = vector.multi_reduction <add>, %185, %cst_64 [1] : vector<8x8xf32> to vector<8xf32>
    %198 = vector.shape_cast %197 : vector<8xf32> to vector<8x1xf32>
    %cst_65 = arith.constant dense<0.000000e+00> : vector<1xf32>
    %199 = vector.multi_reduction <add>, %198, %cst_65 [0] : vector<8x1xf32> to vector<1xf32>
    %200 = vector.shape_cast %199 : vector<1xf32> to vector<1x1xf32>
    %cst_66 = arith.constant dense<0.000000e+00> : vector<8xf32>
    %201 = vector.multi_reduction <add>, %196, %cst_66 [1] : vector<8x4xf32> to vector<8xf32>
    %202 = vector.shape_cast %201 : vector<8xf32> to vector<8x1xf32>
    %cst_67 = arith.constant dense<0.000000e+00> : vector<1xf32>
    %203 = vector.multi_reduction <add>, %202, %cst_67 [0] : vector<8x1xf32> to vector<1xf32>
    %204 = vector.shape_cast %203 : vector<1xf32> to vector<1x1xf32>
    %cst_68 = arith.constant 7.000000e+00 : f32
    %205 = vector.broadcast %cst_68 : f32 to vector<1x1xf32>
    %206 = arith.mulf %205, %204 : vector<1x1xf32>
    %207 = arith.addf %200, %206 : vector<1x1xf32>
    %cst_69 = arith.constant 1.250000e-01 : f32
    %208 = vector.broadcast %cst_69 : f32 to vector<1x1xf32>
    %209 = arith.mulf %207, %208 : vector<1x1xf32>
    %c0_70 = arith.constant 0 : index
    %c0_71 = arith.constant 0 : index
    %210 = vector.load %arg9[%c0_70, %c0_71] : memref<1x1xf32, #tpu.memory_space<vmem>>, vector<1x1xf32>
    tpu.vector_store %arg9[%c0_70, %c0_71], %209 {strides = array<i32>} : memref<1x1xf32, #tpu.memory_space<vmem>>, vector<1x1xf32>,
    return
  }
}

</mosaic_0001>

<bundles_post_ra>
// kernel: tpu_custom_call.1
= control target key start
LH: loop header
LB: loop body
LE: loop exit
PB: predicated region body
PF: predicated region fallthrough
CT: control target
= control target key end

     0   :  { %14 = vsyncpa [#allocation3], 0  ;;  %s1348_s0 = inlined_call_operand.vmem [shape: f32[8,128], index: 0, kind: input, shape index: {}]   ;;  %s1349_s1 = inlined_call_operand.hbm [shape: f32[8,128], index: 1, kind: input, shape index: {}]   ;;  %s1350_s2 = inlined_call_operand.vmem [shape: f32[8,128], index: 2, kind: input, shape index: {}]   ;;  %s1351_s3 = inlined_call_operand.hbm [shape: f32[8,128], index: 3, kind: input, shape index: {}]   ;;  %s1352_s4 = inlined_call_operand.hbm [shape: f32[4,128], index: 4, kind: input, shape index: {}]   ;;  %s1353_s5 = inlined_call_operand.vmem [shape: f32[8,128], index: 5, kind: input, shape index: {}]   ;;  %s1354_s6 = inlined_call_operand.vmem [shape: s32[8,1], index: 6, kind: input, shape index: {}]   ;;  %s1355_s7 = inlined_call_operand.vmem [shape: s32[1,8], index: 7, kind: input, shape index: {}]   ;;  %s1356_s8 = inlined_call_operand.vmem [shape: s32[1,4], index: 8, kind: input, shape index: {}]   ;;  %s1357_s9 = inlined_call_operand.hbm [shape: f32[1,1], index: 9, kind: output, shape index: {}]  }
   0x1   :  { %15 = vsyncpa [#allocation6], 0 }
   0x2   :  { %16 = vsyncpa [#allocation4], 0  ;;  %s1122_s30 = smov [#allocation5]   ;;  %s1123_s11 = smov [#allocation2]  }
   0x3   :  { %s37_s10 = sshll.u32 %s1122_s30, 4  ;;  %s25_s12 = sshll.u32 %s1123_s11, 4  ;;  %s38_s10 = int_to_ptr.vmem [resolvable:$true] %s37_s10  ;;  %s26_s12 = int_to_ptr.vmem [resolvable:$true] %s25_s12 }
   0x4   :  { %s1028_s15 = scalar_lea.hbm %s1351_s3, 128 }
   0x5   :  { %p1029_p0 = scmp.ne.s32.totalorder %s1351_s3, %s1028_s15  ;;  %p1032_p1 = scmp.lt.u32.totalorder %s1028_s15, %s1351_s3 }
   0x7   :  { %p1034_p2 = pnand %p1032_p1, %p1029_p0 }
   0x9   :  { %1037 = shalt.err (!%p1034_p2)
}
   0xa   :  { %s1038_s20 = scalar_lea.vmem %s38_s10, 128  ;;  %p1043_p4 = scmp.lt.s32.totalorder %s38_s10, %s38_s10 }
   0xb   :  { %p1039_p3 = scmp.ne.s32.totalorder %s38_s10, %s1038_s20  ;;  %p1044_p5 = scmp.lt.s32.totalorder %s1038_s20, %s1038_s20 }
   0xd   :  { %p1045_p6 = por %p1044_p5, %p1043_p4 }
   0xf   :  { %p1046_p7 = pnand %p1045_p6, %p1039_p3 }
  0x11   :  { %1049 = shalt.err (!%p1046_p7)
}
  0x12   :  { %40 = dma.hbm_to_vmem [thread:$0]  %s1351_s3, 128, %s38_s10, [#allocation6]  }
  0x13   :  { %s1050_s25 = scalar_lea.hbm %s1349_s1, 128 }
  0x14   :  { %p1051_p8 = scmp.ne.s32.totalorder %s1349_s1, %s1050_s25  ;;  %p1054_p9 = scmp.lt.u32.totalorder %s1050_s25, %s1349_s1 }
  0x16   :  { %p1056_p10 = pnand %p1054_p9, %p1051_p8 }
  0x18   :  { %1059 = shalt.err (!%p1056_p10)
}
  0x19   :  { %s1060_s30 = scalar_lea.vmem %s26_s12, 128  ;;  %p1065_p12 = scmp.lt.s32.totalorder %s26_s12, %s26_s12 }
  0x1a   :  { %p1061_p11 = scmp.ne.s32.totalorder %s26_s12, %s1060_s30  ;;  %p1066_p13 = scmp.lt.s32.totalorder %s1060_s30, %s1060_s30 }
  0x1c   :  { %p1067_p0 = por %p1066_p13, %p1065_p12 }
  0x1e   :  { %p1068_p1 = pnand %p1067_p0, %p1061_p11 }
  0x20   :  { %1071 = shalt.err (!%p1068_p1)
}
  0x21   :  { %28 = dma.hbm_to_vmem [thread:$0]  %s1349_s1, 128, %s26_s12, [#allocation3]  }
  0x22   :  { %s1124_s11 = smov [#allocation7]   ;;  %s1072_s16 = scalar_lea.hbm %s1352_s4, 64 }
  0x23   :  { %s47_s13 = sshll.u32 %s1124_s11, 4  ;;  %p1073_p2 = scmp.ne.s32.totalorder %s1352_s4, %s1072_s16  ;;  %s48_s13 = int_to_ptr.vmem [resolvable:$true] %s47_s13 }
  0x24   :  { %p1076_p3 = scmp.lt.u32.totalorder %s1072_s16, %s1352_s4 }
  0x26   :  { %p1078_p4 = pnand %p1076_p3, %p1073_p2 }
  0x28   :  { %1081 = shalt.err (!%p1078_p4)
}
  0x29   :  { %s1082_s21 = scalar_lea.vmem %s48_s13, 64  ;;  %p1087_p6 = scmp.lt.s32.totalorder %s48_s13, %s48_s13 }
  0x2a   :  { %p1083_p5 = scmp.ne.s32.totalorder %s48_s13, %s1082_s21  ;;  %p1088_p7 = scmp.lt.s32.totalorder %s1082_s21, %s1082_s21 }
  0x2c   :  { %p1089_p8 = por %p1088_p7, %p1087_p6 }
  0x2e   :  { %p1090_p9 = pnand %p1089_p8, %p1083_p5 }
  0x30   :  { %1093 = shalt.err (!%p1090_p9)
}
  0x31   :  { %50 = dma.hbm_to_vmem [thread:$0]  %s1352_s4, 64, %s48_s13, [#allocation6]  }
  0x32   :  { %1116 = dma.done.wait [#allocation3], 128  }
  0x33   :  { %1117 = vsyncadd [#allocation3], 4294967168 }
  0x34   :  { %1118 = dma.done.wait [#allocation6], 192  }
  0x35   :  { %1119 = vsyncadd [#allocation6], 4294967104  ;;  %v1125_v0 = vmov 0.0   ;;  %vm1126_vm0 = vmmov 0   ;;  %v73_v1 = vld [vmem:[%s1353_s5] sm:$0xff]  ;;  %v71_v5 = vld [vmem:[#allocation5] sm:$0xff]  ;;  %v74_v9 = vlaneseq }
  0x36   :  { %940 = vmatprep.subr.mxu1 %v1125_v0  ;;  %942 = vmatprep.mubr.msk.f32.mxu1 %vm1126_vm0, %v1125_v0  ;;  %v70_v2 = vld [vmem:[%s1350_s2] sm:$0xff]  ;;  %v442_v6 = vmul.f32 %v71_v5, %v71_v5  ;;  %v1248_v7 = vld [vmem:[#allocation7] sm:$0xf]  ;;  %v1127_v8 = vmov 1.0   ;;  %vm152_vm2 = vcmask 64512   ;;  %vm514_vm3 = vcmask 1043456  }
  0x37   :  { %950 = vmatprep.subr.mxu0 %v1125_v0  ;;  %952 = vmatprep.mubr.msk.f32.mxu0 %vm1126_vm0, %v1125_v0  ;;  %v68_v3 = vld [vmem:[%s1348_s0] sm:$0xff]  ;;  %v1256_v10 = vshrl.u32 %v74_v9, 7  ;;  %v77_v11 = vand.u32 127, %v74_v9  ;;  %vm596_vm4 = vcmask 60416   ;;  %vm986_vm5 = vmpackc.low %vm152_vm2, %vm152_vm2  ;;  %s1130_s27 = smov 8   ;;  %s1131_s28 = smov 16  }
  0x38   :  { %941 = vmatpush3.xpose.msra.mxu1 %v73_v1  ;;  %951 = vmatpush3.xpose.msra.mxu0 %v70_v2  ;;  %v69_v4 = vld [vmem:[#allocation2] sm:$0xff]  ;;  %s1133_s29 = smov 112   ;;  %vm791_vm8 = vcmask 31744   ;;  %vm893_vm9 = vcmask 0  }
  0x39   :  { %945 = vmatprep.subr.mxu1 %v1125_v0  ;;  %960 = vmatprep.subr.mxu0 %v1125_v0  ;;  %vm78_vm1 = vcmp.eq.s32.totalorder %v1256_v10, %v77_v11  ;;  %v513_v11 = vmul.f32 %v1248_v7, %v1248_v7 }
  0x3a   :  { %v911_v16 = vsel %vm78_vm1, 1.0, %v1125_v0 }
  0x3b   :  { %943 = vmatmul.mubr.f32.vlgmr.msra.gmra.mrb[0].mxu1 %v73_v1  ;;  %953 = vmatmul.mubr.f32.vlgmr.msra.gmra.mrb[0].mxu0 %v70_v2 }
  0x3c   :  { %946 = vmatpush3.xpose.msra.mxu1 %v68_v3  ;;  %947 = vmatprep.mubr.msk.f32.mxu1 %vm1126_vm0, %v1125_v0 }
  0x3d   :  { %955 = vmatprep.subr.mxu1 %v1125_v0  ;;  %962 = vmatprep.mubr.msk.f32.mxu0 %vm1126_vm0, %v1125_v0 }
  0x3e   :  { %961 = vmatpush3.xpose.msra.mxu0 %v442_v6 }
  0x3f   :  { %948 = vmatmul.mubr.f32.vlgmr.msra.gmra.mrb[2].mxu1 %v68_v3 }
  0x40   :  { %956 = vmatpush3.xpose.msra.mxu1 %v69_v4  ;;  %957 = vmatprep.mubr.msk.f32.mxu1 %vm1126_vm0, %v1125_v0 }
  0x41   :  { %965 = vmatprep.subr.mxu1 %v1125_v0  ;;  %963 = vmatmul.mubr.f32.vlgmr.msra.gmra.mrb[2].mxu0 %v1127_v8 }
  0x42   :  { %976 = vmatprep.mubr.msk.f32.mxu0 %vm1126_vm0, %v1125_v0 }
  0x43   :  { %958 = vmatmul.mubr.f32.vlgmr.msra.gmra.mrb[4].mxu1 %v69_v4 }
  0x44   :  { %967 = vmatprep.mubr.msk.f32.mxu1 %vm1126_vm0, %v1125_v0  ;;  %966 = vmatpush3.xpose.msra.mxu1 %v71_v5 }
  0x45   :  { %979 = vmatprep.subr.mxu1 %v1125_v0 }
  0x47   :  { %968 = vmatmul.mubr.f32.vlgmr.msra.gmra.mrb[6].mxu1 %v1248_v7  ;;  %v764_v7 = vld [vmem:[%s1354_s6] sm:$0xff] }
  0x48   :  { %981 = vmatprep.mubr.msk.f32.mxu1 %vm1126_vm0, %v1125_v0 }
 0x10e   :  { %v147_v12 = vpop.f32.mrb[0].mxu1  ;;  %v328_v13 = vpop.f32.mrb[0].mxu0 }
 0x10f   :  { %v944_v14 = vpop.f32.mrb[1].mxu1  ;;  %v954_v15 = vpop.f32.mrb[1].mxu0  ;;  %v332_v20 = vmul.f32 %v911_v16, %v328_v13  ;;  %v151_v25 = vmul.f32 %v911_v16, %v147_v12  ;;  %v343_v56 = vmul.f32 2.0, %v328_v13  ;;  %v163_v4 = vmul.f32 2.0, %v147_v12 }
 0x110   :  { %v515_v12 = vsel %vm514_vm3, %v513_v11, 0.0 }
 0x111   :  { %v333_v26 = vsel %vm152_vm2, %v332_v20, 0.0  ;;  %v153_v28 = vsel %vm152_vm2, %v151_v25, 0.0 }
 0x112   :  { %v238_v17 = vpop.f32.mrb[2].mxu1  ;;  %v336_v31 = vrot.slane %v333_v26, 4  ;;  %v156_v36 = vrot.slane %v153_v28, 4 }
 0x113   :  { %v242_v18 = vmul.f32 %v911_v16, %v238_v17  ;;  %v949_v19 = vpop.f32.mrb[3].mxu1  ;;  %v253_v50 = vmul.f32 2.0, %v238_v17 }
 0x114   :  { %v337_v34 = vadd.f32 %v336_v31, %v333_v26  ;;  %v157_v39 = vadd.f32 %v156_v36, %v153_v28 }
 0x115   :  { %v243_v21 = vsel %vm152_vm2, %v242_v18, 0.0  ;;  %v509_v18 = vpop.f32.mrb[2].mxu0 }
 0x116   :  { %244 = vadd.xlane.f32.xlu0 %v243_v21  ;;  %v418_v22 = vpop.f32.mrb[4].mxu1  ;;  %v246_v29 = vrot.slane %v243_v21, 4  ;;  %v338_v37 = vrot.slane %v337_v34, 2  ;;  %v158_v41 = vrot.slane %v157_v39, 2  ;;  %v964_v19 = vpop.f32.mrb[3].mxu0 }
 0x117   :  { %v422_v23 = vmul.f32 %v911_v16, %v418_v22  ;;  %v959_v24 = vpop.f32.mrb[5].mxu1  ;;  %v433_v59 = vmul.f32 2.0, %v418_v22  ;;  %v1128_v22 = vmov 0  }
 0x118   :  { %v247_v30 = vadd.f32 %v246_v29, %v243_v21  ;;  %v339_v43 = vadd.f32 %v338_v37, %v337_v34  ;;  %v159_v48 = vadd.f32 %v158_v41, %v157_v39  ;;  %1001 = vset.pattern.permute.xlu0 %v1128_v22 }
 0x119   :  { %v423_v27 = vsel %vm152_vm2, %v422_v23, 0.0  ;;  %v1129_v23 = vmov 0.0|0.0  }
 0x11a   :  { %334 = vadd.xlane.f32.xlu0 %v333_v26  ;;  %424 = vadd.xlane.f32.xlu1 %v423_v27  ;;  %v426_v32 = vrot.slane %v423_v27, 4  ;;  %v248_v33 = vrot.slane %v247_v30, 2  ;;  %v340_v46 = vrot.slane %v339_v43, 1  ;;  %v160_v55 = vrot.slane %v159_v48, 1  ;;  %v584_v20 = vpop.f32.mrb[6].mxu1 }
 0x11b   :  { %v969_v21 = vpop.f32.mrb[7].mxu1  ;;  %984 = vmatprep.subr.bf16.mxu0 %v1129_v23  ;;  %v590_v26 = vsub.s32 0, %v1256_v10  ;;  %v593_v31 = vmul.f32 2.0, %v584_v20 }
 0x11c   :  { %v427_v35 = vadd.f32 %v426_v32, %v423_v27  ;;  %v249_v40 = vadd.f32 %v248_v33, %v247_v30  ;;  %v341_v53 = vadd.f32 %v340_v46, %v339_v43  ;;  %v161_v3 = vadd.f32 %v160_v55, %v159_v48 }
 0x11d   :  { %v591_v30 = vrot.slane %v509_v18, %v590_v26 }
 0x11e   :  { %154 = vadd.xlane.f32.xlu1 %v153_v28  ;;  %v428_v38 = vrot.slane %v427_v35, 2  ;;  %v250_v42 = vrot.slane %v249_v40, 1 }
 0x120   :  { %v429_v44 = vadd.f32 %v428_v38, %v427_v35  ;;  %v251_v45 = vadd.f32 %v250_v42, %v249_v40 }
 0x122   :  { %v430_v47 = vrot.slane %v429_v44, 1 }
 0x124   :  { %v431_v54 = vadd.f32 %v430_v47, %v429_v44  ;;  %v918_v44 = vld [vmem:[%s1355_s7] ss:$0 sm:$0xff]  ;;  %s1132_s7 = smov 120  }
 0x1a3   :  { %v245_v49 = vpop.xlane.xlu0 %244 }
 0x1a4   :  { %v252_v51 = vadd.f32 %v251_v45, %v245_v49 }
 0x1a6   :  { %v1264_v52 = vsub.f32 %v252_v51, %v253_v50 }
 0x1a7   :  { %v335_v57 = vpop.xlane.xlu0 %334  ;;  %v425_v58 = vpop.xlane.xlu1 %424 }
 0x1a8   :  { %v342_v60 = vadd.f32 %v341_v53, %v335_v57  ;;  %v432_v61 = vadd.f32 %v431_v54, %v425_v58  ;;  %v255_v62 = vmul.f32 %v1264_v52, %v1264_v52 }
 0x1aa   :  { %v344_v63 = vsub.f32 %v342_v60, %v343_v56  ;;  %v1268_v1 = vsub.f32 %v432_v61, %v433_v59  ;;  %v256_v2 = vsel %vm152_vm2, %v255_v62, 0.0 }
 0x1ab   :  { %257 = vadd.xlane.f32.xlu0 %v256_v2  ;;  %v155_v5 = vpop.xlane.xlu1 %154 }
 0x1ac   :  { %v162_v6 = vadd.f32 %v161_v3, %v155_v5  ;;  %v345_v8 = vmul.f32 %v344_v63, %v344_v63  ;;  %v435_v9 = vmul.f32 %v1268_v1, %v1268_v1 }
 0x1ae   :  { %v164_v13 = vsub.f32 %v162_v6, %v163_v4  ;;  %v346_v14 = vsel %vm152_vm2, %v345_v8, 0.0  ;;  %v436_v15 = vsel %vm152_vm2, %v435_v9, 0.0 }
 0x1af   :  { %347 = vadd.xlane.f32.xlu1 %v346_v14  ;;  %437 = vadd.xlane.f32.xlu0 %v436_v15 }
 0x1b0   :  { %v165_v16 = vmul.f32 %v164_v13, %v164_v13 }
 0x1b2   :  { %v166_v17 = vsel %vm152_vm2, %v165_v16, 0.0 }
 0x1b3   :  { %167 = vadd.xlane.f32.xlu1 %v166_v17  ;;  %516 = vadd.xlane.f32.xlu0 %v515_v12 }
 0x1c9   :  { %767 = vperm.xlu0 %1001, %v764_v7  }
 0x238   :  { %v258_v24 = vpop.xlane.xlu0 %257 }
 0x239   :  { %v259_v25 = vmax.f32 %v258_v24, 1e-24 }
 0x23b   :  { %1002 = vrsqrt.f32 %v259_v25 }
 0x23c   :  { %v348_v27 = vpop.xlane.xlu1 %347  ;;  %v438_v28 = vpop.xlane.xlu0 %437 }
 0x23d   :  { %v349_v29 = vmax.f32 %v348_v27, 1e-24  ;;  %v439_v34 = vmax.f32 %v438_v28, 1e-24 }
 0x23f   :  { %1004 = vrsqrt.f32 %v349_v29 }
 0x240   :  { %v517_v32 = vpop.xlane.xlu0 %516  ;;  %v168_v35 = vpop.xlane.xlu1 %167  ;;  %1006 = vrsqrt.f32 %v439_v34 }
 0x241   :  { %v592_v33 = vadd.f32 %v591_v30, %v517_v32  ;;  %v169_v38 = vmax.f32 %v168_v35, 1e-24 }
 0x243   :  { %v594_v36 = vsub.f32 %v592_v33, %v593_v31  ;;  %1008 = vrsqrt.f32 %v169_v38 }
 0x245   :  { %v595_v37 = vmul.f32 %v594_v36, %v594_v36  ;;  %v1003_v39 = vpop.eup %1002 }
 0x246   :  { %v261_v41 = vmul.f32 %v1003_v39, %v1264_v52 }
 0x247   :  { %v597_v40 = vsel %vm596_vm4, %v595_v37, 0.0 }
 0x248   :  { %598 = vadd.xlane.f32.xlu1 %v597_v40  ;;  %v768_v45 = vpop.permute.xlu0 %767 }
 0x249   :  { %v1005_v10 = vpop.eup %1004  ;;  %vm773_vm6 = vcmp.ne.s32.totalorder %v768_v45, %v918_v44 }
 0x24a   :  { %v351_v42 = vmul.f32 %v1005_v10, %v344_v63  ;;  %v1007_v46 = vpop.eup %1006  ;;  %v919_v49 = vsel %vm773_vm6, 1.0, %v1125_v0 }
 0x24b   :  { %v441_v48 = vmul.f32 %v1007_v46, %v1268_v1  ;;  %v1308_v8 = vsub.f32 1.0, %v919_v49 }
 0x24c   :  { %v985_v43 = vpack.c.bf16 %v351_v42, %v261_v41 }
 0x24d   :  { %v1009_v47 = vpop.eup %1008  ;;  %v786_v21 = vsel %vm152_vm2, %v1308_v8, 0.0 }
 0x24e   :  { %987 = vmatpush3.bf16.xpose.msk.msra.mxu0 %vm986_vm5, %v985_v43  ;;  %v171_v50 = vmul.f32 %v1009_v47, %v164_v13  ;;  %v920_v13 = vld [vmem:[%s1356_s8] ss:$0 sm:$0xff]  ;;  %s1134_s8 = smov [#allocation8]  }
 0x24f   :  { %974 = vmatprep.subr.mxu0 %v1125_v0  ;;  %vm781_vm7 = vcmp.ne.s32.totalorder %v768_v45, %v920_v13  ;;  %s901_s10 = sshll.u32 %s1134_s8, 4  ;;  %s902_s10 = int_to_ptr.vmem [resolvable:$true] %s901_s10 }
 0x250   :  { %v921_v16 = vsel %vm781_vm7, 1.0, %v1125_v0  ;;  %s1094_s11 = scalar_lea.vmem %s902_s10, 16  ;;  %s1098_s13 = scalar_lea.vmem %s902_s10, 32 }
 0x251   :  { %v785_v12 = vsub.f32 1.0, %v921_v16  ;;  %p1095_p10 = scmp.ne.s32.totalorder %s902_s10, %s1094_s11  ;;  %p1099_p11 = scmp.lt.s32.totalorder %s902_s10, %s902_s10 }
 0x252   :  { %p1100_p12 = scmp.lt.s32.totalorder %s1098_s13, %s1094_s11 }
 0x253   :  { %v792_v19 = vsel %vm791_vm8, %v785_v12, 0.0 }
 0x254   :  { %p1101_p13 = por %p1100_p12, %p1099_p11 }
 0x256   :  { %975 = vmatpush3.xpose.msk.msra.mxu0 %vm152_vm2, %v441_v48  ;;  %p1102_p0 = pnand %p1101_p13, %p1095_p10 }
 0x259   :  { %977 = vmatmul.mubr.msk.f32.vlgmr.msra.gmra.mrb[4].mxu0 %vm152_vm2, %v171_v50  ;;  %809 = vrot.lane.b32.xlu1 %v919_v49, %s1130_s27 }
 0x25d   :  { %835 = vrot.lane.b32.xlu1 %v919_v49, %s1131_s28 }
 0x2d5   :  { %v599_v51 = vpop.xlane.xlu1 %598 }
 0x2d6   :  { %v600_v52 = vmax.f32 %v599_v51, 1e-24 }
 0x2d8   :  { %1010 = vrsqrt.f32 %v600_v52 }
 0x2d9   :  { %v810_v59 = vpop.permute.xlu1 %809 }
 0x2dd   :  { %v836_v62 = vpop.permute.xlu1 %835 }
 0x2e2   :  { %v1011_v53 = vpop.eup %1010 }
 0x2e3   :  { %v602_v54 = vmul.f32 %v1011_v53, %v594_v36 }
 0x2e5   :  { %980 = vmatpush3.xpose.msk.msra.mxu1 %vm152_vm2, %v602_v54 }
 0x2e8   :  { %982 = vmatmul.mubr.msk.f32.vlgmr.msra.gmra.mrb[8].mxu1 %vm152_vm2, %v171_v50 }
 0x32c   :  { %v681_v55 = vpop.f32.mrb[4].mxu0 }
 0x32d   :  { %v1297_v56 = vmul.f32 10.0, %v681_v55  ;;  %v978_v57 = vpop.f32.mrb[5].mxu0 }
 0x32f   :  { %v760_v58 = vmul.f32 1.442695, %v1297_v56 }
 0x331   :  { %1012 = vpow2.f32 %v760_v58 }
 0x33b   :  { %v1300_v60 = vpop.eup %1012 }
 0x33c   :  { %v812_v61 = vmul.f32 %v1300_v60, %v810_v59  ;;  %v838_v63 = vmul.f32 %v1300_v60, %v836_v62  ;;  %v798_v14 = vmul.f32 %v1300_v60, %v919_v49  ;;  %v802_v48 = vmul.f32 %v1300_v60, %v1308_v8 }
 0x33e   :  { %814 = vrot.lane.b32.xlu1 %v812_v61, %s1132_s7  ;;  %v799_v17 = vsel %vm152_vm2, %v798_v14, 0.0 }
 0x342   :  { %840 = vrot.lane.b32.xlu1 %v838_v63, %s1133_s29 }
 0x3b0   :  { %v815_v1 = vpop.permute.xlu1 %814 }
 0x3b1   :  { %v817_v2 = vsel %vm152_vm2, %v815_v1, 0.0 }
 0x3b2   :  { %818 = vadd.xlane.f32.xlu1 %v817_v2 }
 0x3b4   :  { %v841_v3 = vpop.permute.xlu1 %840 }
 0x3b5   :  { %v843_v4 = vsel %vm152_vm2, %v841_v3, 0.0 }
 0x3b6   :  { %844 = vadd.xlane.f32.xlu0 %v843_v4 }
 0x3bb   :  { %v755_v5 = vpop.f32.mrb[8].mxu1 }
 0x3bc   :  { %v983_v6 = vpop.f32.mrb[9].mxu1  ;;  %v759_v9 = vmul.f32 10.0, %v755_v5 }
 0x3be   :  { %v762_v11 = vmul.f32 1.442695, %v759_v9 }
 0x3c0   :  { %1014 = vpow2.f32 %v762_v11 }
 0x3c3   :  { %821 = vrot.lane.b32.xlu1 %v1308_v8, %s1130_s27 }
 0x3ca   :  { %v1015_v15 = vpop.eup %1014 }
 0x3cb   :  { %v861_v18 = vmul.f32 %v1015_v15, %v921_v16  ;;  %v865_v37 = vmul.f32 %v1015_v15, %v785_v12 }
 0x3cc   :  { %846 = vrot.lane.b32.xlu0 %v1308_v8, %s1131_s28 }
 0x3cd   :  { %v862_v20 = vsel %vm791_vm8, %v861_v18, 0.0 }
 0x3e7   :  { %800 = vadd.xlane.f32.xlu1 %v799_v17 }
 0x3eb   :  { %793 = vadd.xlane.f32.xlu1 %v792_v19  ;;  %863 = vadd.xlane.f32.xlu0 %v862_v20 }
 0x3ef   :  { %787 = vadd.xlane.f32.xlu1 %v786_v21 }
 0x43f   :  { %v819_v22 = vpop.xlane.xlu1 %818 }
 0x443   :  { %v845_v7 = vpop.xlane.xlu0 %844  ;;  %v822_v23 = vpop.permute.xlu1 %821 }
 0x444   :  { %v824_v0 = vmul.f32 %v1300_v60, %v822_v23 }
 0x446   :  { %v825_v24 = vadd.f32 %v824_v0, %v819_v22 }
 0x447   :  { %v847_v25 = vpop.permute.xlu0 %846 }
 0x448   :  { %1016 = vlog2.f32 %v825_v24  ;;  %v849_v26 = vmul.f32 %v1300_v60, %v847_v25 }
 0x44a   :  { %v850_v27 = vadd.f32 %v849_v26, %v845_v7 }
 0x44c   :  { %1018 = vlog2.f32 %v850_v27 }
 0x452   :  { %v1017_v28 = vpop.eup %1016 }
 0x453   :  { %v827_v29 = vmul.f32 0.6931472, %v1017_v28 }
 0x455   :  { %v828_v30 = vsub.f32 %v827_v29, %v1297_v56 }
 0x456   :  { %v1019_v31 = vpop.eup %1018 }
 0x457   :  { %v829_v32 = vmul.f32 %v828_v30, %v822_v23  ;;  %v852_v33 = vmul.f32 0.6931472, %v1019_v31 }
 0x459   :  { %v853_v34 = vsub.f32 %v852_v33, %v1297_v56  ;;  %831 = vrot.lane.b32.xlu1 %v829_v32, %s1132_s7 }
 0x45b   :  { %v854_v35 = vmul.f32 %v853_v34, %v847_v25 }
 0x45d   :  { %856 = vrot.lane.b32.xlu0 %v854_v35, %s1133_s29 }
 0x474   :  { %v801_v36 = vpop.xlane.xlu1 %800 }
 0x475   :  { %v803_v49 = vadd.f32 %v802_v48, %v801_v36 }
 0x478   :  { %v864_v38 = vpop.xlane.xlu0 %863  ;;  %v794_v40 = vpop.xlane.xlu1 %793 }
 0x479   :  { %v866_v39 = vadd.f32 %v865_v37, %v864_v38  ;;  %v795_v10 = vadd.f32 1e-12, %v794_v40 }
 0x47b   :  { %1020 = vlog2.f32 %v866_v39 }
 0x47c   :  { %1022 = vrcp.f32 %v795_v10  ;;  %v788_v52 = vpop.xlane.xlu1 %787 }
 0x47d   :  { %1024 = vlog2.f32 %v803_v49 }
 0x47e   :  { %1026 = vrcp.f32 %v788_v52 }
 0x485   :  { %v1021_v41 = vpop.eup %1020 }
 0x486   :  { %v868_v42 = vmul.f32 0.6931472, %v1021_v41  ;;  %v1023_v45 = vpop.eup %1022 }
 0x487   :  { %v1025_v50 = vpop.eup %1024 }
 0x488   :  { %v869_v43 = vsub.f32 %v868_v42, %v759_v9  ;;  %v805_v51 = vmul.f32 0.6931472, %v1025_v50  ;;  %v1027_v61 = vpop.eup %1026 }
 0x48a   :  { %v870_v44 = vmul.f32 %v869_v43, %v785_v12  ;;  %v806_v53 = vsub.f32 %v805_v51, %v1297_v56 }
 0x48c   :  { %v871_v46 = vmul.f32 %v1023_v45, %v870_v44  ;;  %v807_v55 = vmul.f32 %v806_v53, %v1308_v8 }
 0x48e   :  { %v881_v47 = vsel %vm791_vm8, %v871_v46, 0.0 }
 0x48f   :  { %882 = vadd.xlane.f32.xlu1 %v881_v47 }
 0x4cb   :  { %v832_v54 = vpop.permute.xlu1 %831 }
 0x4cc   :  { %v834_v57 = vadd.f32 %v832_v54, %v807_v55 }
 0x4cf   :  { %v857_v58 = vpop.permute.xlu0 %856 }
 0x4d0   :  { %v859_v59 = vadd.f32 %v857_v58, %v834_v57 }
 0x4d2   :  { %v860_v62 = vmul.f32 %v1027_v61, %v859_v59 }
 0x4d4   :  { %v872_v63 = vsel %vm152_vm2, %v860_v62, 0.0 }
 0x4d5   :  { %873 = vadd.xlane.f32.xlu0 %v872_v63 }
 0x51c   :  { %v883_v60 = vpop.xlane.xlu1 %882 }
 0x51d   :  { %v884_v1 = vrot.slane %v883_v60, 4 }
 0x51f   :  { %v885_v2 = vadd.f32 %v884_v1, %v883_v60 }
 0x521   :  { %v886_v3 = vrot.slane %v885_v2, 2 }
 0x523   :  { %v887_v4 = vadd.f32 %v886_v3, %v885_v2 }
 0x525   :  { %v888_v9 = vrot.slane %v887_v4, 1 }
 0x527   :  { %v889_v13 = vadd.f32 %v888_v9, %v887_v4 }
 0x529   :  { %v890_v15 = vmul.f32 7.0, %v889_v13 }
 0x562   :  { %v874_v5 = vpop.xlane.xlu0 %873 }
 0x563   :  { %v875_v6 = vrot.slane %v874_v5, 4 }
 0x565   :  { %v876_v56 = vadd.f32 %v875_v6, %v874_v5 }
 0x567   :  { %v877_v11 = vrot.slane %v876_v56, 2 }
 0x569   :  { %v878_v8 = vadd.f32 %v877_v11, %v876_v56 }
 0x56b   :  { %v879_v14 = vrot.slane %v878_v8, 1 }
 0x56d   :  { %v880_v16 = vadd.f32 %v879_v14, %v878_v8 }
 0x56f   :  { %v891_v12 = vadd.f32 %v890_v15, %v880_v16 }
 0x571   :  { %v892_v17 = vmul.f32 0.125, %v891_v12 }
 0x573   :  { %894 = vst.msk [vmem:[#allocation8] sm:$0x1] %vm893_vm9, %v892_v17 }
 0x574   :  { %1105 = shalt.err (!%p1102_p0)
}
 0x575   :  { %s1106_s16 = scalar_lea.hbm %s1357_s9, 16 }
 0x576   :  { %p1107_p1 = scmp.ne.s32.totalorder %s1357_s9, %s1106_s16  ;;  %p1110_p2 = scmp.lt.u32.totalorder %s1106_s16, %s1357_s9 }
 0x578   :  { %p1112_p3 = pnand %p1110_p2, %p1107_p1 }
 0x57a   :  { %1115 = shalt.err (!%p1112_p3)
}
 0x57b   :  { %904 = dma.vmem_to_hbm [thread:$0]  %s902_s10, 16, %s1357_s9, [#allocation4]  }
 0x57c   :  { %1120 = dma.done.wait [#allocation4], 16  }
 0x57d   :  { %1121 = vsyncadd [#allocation4], 4294967280 }
 0x57e   :  { %908 = vsyncpa [#allocation3], 1 }
 0x57f   :  { %909 = vsyncpa [#allocation6], 1 }
 0x580   :  { %910 = vsyncpa [#allocation4], 1 }

</bundles_post_ra>
